<compile_context>
chip_gen: v6e
topology: v6e:2x2x1
jax: 0.10.0
libtpu: 0.0.40
codegen_flags: <defaults>
</compile_context>

<pallas_src>
import functools
import math

import jax
import jax.numpy as jnp
from jax import lax
from jax.experimental import pallas as pl
from jax.experimental.pallas import tpu as pltpu
from jax.scipy import special as jsp_special

IGNORE_INDEX = -100
_HALF_LOG_2PI = 0.9189385332046727  # 0.5 * log(2*pi)


def _lgamma_digamma(x, shift):
    """lgamma(x), digamma(x) via unconditional shift-by-`shift` + Stirling series.

    Accurate (~1e-6 abs in f32) whenever x + shift >= ~6, i.e. x >= 6 - shift, and
    also for any larger x thanks to the single `x < 6` guard (which additionally
    prevents f32 overflow of the shift polynomial for huge x).
    Uses only log / divide / mul / add / where, all supported by Mosaic.
    """
    if shift > 0:
        small = x < 6.0
        xs = jnp.where(small, x, 1.0)           # keeps prod tiny when no shift is needed
        prod = xs                                # prod  = x (x+1) ... (x+shift-1)
        dprod = jnp.ones_like(xs)                # dprod = d/dx prod
        for k in range(1, shift):
            f = xs + float(k)
            dprod = dprod * f + prod
            prod = prod * f
        z = jnp.where(small, x + float(shift), x)
    else:
        small = None
        z = x

    zi = 1.0 / z
    zi2 = zi * zi
    log_z = jnp.log(z)
    lg_series = zi * (1.0 / 12.0 + zi2 * (-1.0 / 360.0
                      + zi2 * (1.0 / 1260.0 + zi2 * (-1.0 / 1680.0))))
    dg_series = zi2 * (1.0 / 12.0 - zi2 * (1.0 / 120.0 - zi2 * (1.0 / 252.0)))
    lgamma = (z - 0.5) * log_z - z + _HALF_LOG_2PI + lg_series
    digamma = log_z - 0.5 * zi - dg_series

    if shift > 0:
        # lgamma(x) = lgamma(x+shift) - log(prod); digamma(x) = digamma(x+shift) - sum 1/(x+k)
        lgamma = lgamma - jnp.where(small, jnp.log(prod), 0.0)
        digamma = digamma - jnp.where(small, dprod / prod, 0.0)
    return lgamma, digamma


def _pac_kernel(coeff_ref, ev_ref, tg_ref, *refs, hw, n_classes, tile_rows,
                ignore_index, mask_pad, use_count):
    if use_count:
        sum_ref, cnt_ref, acc_sum, acc_cnt = refs
    else:
        sum_ref, acc_sum = refs

    t = pl.program_id(2)

    # Reset the dense accumulators at the start of every (batch, chunk) strip.
    @pl.when(t == 0)
    def _():
        acc_sum[...] = jnp.zeros_like(acc_sum)
        if use_count:
            acc_cnt[...] = jnp.zeros_like(acc_cnt)

    ev = ev_ref[...].astype(jnp.float32)   # (C, tile_rows, 128): class leading, pixels dense
    tg = tg_ref[...].astype(jnp.float32)
    coeff = coeff_ref[0, 0]

    alpha = ev + 1.0
    s = jnp.sum(alpha, axis=0)                                       # (rows, 128)
    log_alpha = jnp.log(alpha)
    pac = jnp.sum(tg, axis=0) * jnp.log(s) - jnp.sum(tg * log_alpha, axis=0)

    alpha_kl = tg + (1.0 - tg) * alpha                               # (C, rows, 128)
    akl_sum = jnp.sum(alpha_kl, axis=0)                              # (rows, 128)

    # alpha_kl >= 1 (evidence >= 0, targets in [0,1])  -> shift 5.
    # akl_sum  >= C                                     -> shorter (or no) shift.
    lg_akl, dg_akl = _lgamma_digamma(alpha_kl, 5)
    lg_sum, dg_sum = _lgamma_digamma(akl_sum, max(0, 6 - n_classes))

    kl_log = lg_sum - math.lgamma(float(n_classes)) - jnp.sum(lg_akl, axis=0)
    #   sum_c (a-1)(dg_a - dg_sum) = sum_c (a-1) dg_a - (akl_sum - C) dg_sum
    kl_dig = jnp.sum((alpha_kl - 1.0) * dg_akl, axis=0) - (akl_sum - n_classes) * dg_sum
    kl = kl_log + kl_dig                                             # (rows, 128)

    loss = pac + coeff * kl                                          # (rows, 128)

    if mask_pad or use_count:
        valid = None
        if mask_pad:
            # Mask pixels past hw (ragged / padded lanes).  Keep the mask ahead of the
            # accumulate so NaN/Inf from garbage lanes never reach acc_sum.
            row_blk = pl.program_id(1) * pl.num_programs(2) + t
            row = lax.broadcasted_iota(jnp.int32, (tile_rows, 128), 0)
            lane = lax.broadcasted_iota(jnp.int32, (tile_rows, 128), 1)
            pix = row_blk * (tile_rows * 128) + row * 128 + lane
            valid = pix < hw
        if use_count:
            # argmax_c targets != ignore_index (only relevant when ignore_index in [0, C)).
            cls = lax.broadcasted_iota(jnp.int32, (n_classes, tile_rows, 128), 0)
            tmax = jnp.max(tg, axis=0)
            arg = jnp.min(jnp.where(tg >= tmax[None, :, :], cls, n_classes), axis=0)
            not_ign = arg != ignore_index
            valid = not_ign if valid is None else jnp.logical_and(valid, not_ign)
        acc_sum[...] += jnp.where(valid, loss, 0.0)
        if use_count:
            acc_cnt[...] += valid.astype(jnp.int32)
    else:
        acc_sum[...] += loss

    # One cross-lane reduce + tiny store, only on the last tile of this strip.
    @pl.when(t == pl.num_programs(2) - 1)
    def _():
        sum_ref[...] = jnp.sum(acc_sum[...]).reshape(1, 1)
        if use_count:
            cnt_ref[...] = jnp.sum(acc_cnt[...]).reshape(1, 1)


def pac_type2_mle_loss(evidence, targets, kl_div_coeff, *,
                       ignore_index=IGNORE_INDEX, reduction="mean", tile_px=32768):
    """evidence, targets: [B, C, H, W]; kl_div_coeff: scalar. Returns scalar f32 (mean)."""
    if reduction != "mean":
        # TODO(synk): reduction != 'mean' (unreduced per-pixel loss map) not implemented.
        raise NotImplementedError("only reduction='mean' is implemented")
    assert evidence.shape == targets.shape
    B, C, H, W = evidence.shape
    hw = H * W

    # Dense (sublane, lane) packing of the pixel axis: (B, C, rows, 128).
    rows = (hw + 127) // 128
    hw_pad = rows * 128
    ev = evidence.reshape(B, C, hw)
    tg = targets.reshape(B, C, hw)
    if hw_pad != hw:
        # Rare (hw not a multiple of 128): zero-pad (alpha=1, targets=0 stay finite, masked).
        pad = ((0, 0), (0, 0), (0, hw_pad - hw))
        ev = jnp.pad(ev, pad)
        tg = jnp.pad(tg, pad)
    ev = ev.reshape(B, C, rows, 128)
    tg = tg.reshape(B, C, rows, 128)

    # Pixel tile = tile_rows * 128 pixels per grid step.
    max_rows = max(1, tile_px // 128)
    if rows <= max_rows:
        tile_rows = rows                       # full extent -> no (8,128) constraint
    else:
        tile_rows = max(8, (max_rows // 8) * 8)
    n_row_blocks = (rows + tile_rows - 1) // tile_rows

    # Split row-blocks into chunks so v7x's 2 TensorCores stay busy even at small batch.
    n_chunks = 2 if (n_row_blocks >= 2 and n_row_blocks % 2 == 0) else 1
    tpc = n_row_blocks // n_chunks             # tiles per chunk ("arbitrary" axis)

    covered_px = n_row_blocks * tile_rows * 128
    use_count = 0 <= ignore_index < C          # argmax is always in [0, C)
    mask_pad = covered_px > hw

    coeff = jnp.asarray(kl_div_coeff, dtype=jnp.float32).reshape(1, 1)

    kernel = functools.partial(
        _pac_kernel, hw=hw, n_classes=C, tile_rows=tile_rows,
        ignore_index=ignore_index, mask_pad=mask_pad, use_count=use_count)

    data_spec = pl.BlockSpec((None, C, tile_rows, 128),
                             lambda b, c, t: (b, 0, c * tpc + t, 0))
    part_spec = pl.BlockSpec((None, None, 1, 1), lambda b, c, t: (b, c, 0, 0))

    in_specs = [
        pl.BlockSpec(memory_space=pltpu.MemorySpace.SMEM),          # kl_div_coeff
        data_spec,                                                  # evidence
        data_spec,                                                  # targets
    ]
    scratch = [pltpu.VMEM((tile_rows, 128), jnp.float32)]
    if use_count:
        out_specs = (part_spec, part_spec)
        out_shape = (jax.ShapeDtypeStruct((B, n_chunks, 1, 1), jnp.float32),
                     jax.ShapeDtypeStruct((B, n_chunks, 1, 1), jnp.int32))
        scratch.append(pltpu.VMEM((tile_rows, 128), jnp.int32))
    else:
        out_specs = part_spec
        out_shape = jax.ShapeDtypeStruct((B, n_chunks, 1, 1), jnp.float32)

    bytes_accessed = (ev.size * ev.dtype.itemsize + tg.size * tg.dtype.itemsize
                      + 4 + B * n_chunks * 8)
    cost = pl.CostEstimate(flops=B * hw * (70 * C + 60),
                           transcendentals=5 * B * hw * (C + 1),
                           bytes_accessed=bytes_accessed)

    out = pl.pallas_call(
        kernel,
        grid=(B, n_chunks, tpc),
        in_specs=in_specs,
        out_specs=out_specs,
        out_shape=out_shape,
        scratch_shapes=scratch,
        compiler_params=pltpu.CompilerParams(
            dimension_semantics=("parallel", "parallel", "arbitrary")),
        cost_estimate=cost,
    )(coeff, ev, tg)

    if use_count:
        sum_p, cnt_p = out
        total = jnp.sum(sum_p)
        count = jnp.sum(cnt_p).astype(jnp.float32)
    else:
        total = jnp.sum(out)
        count = jnp.float32(B * hw)
    return total / count


def _reference_loss(evidence, targets, kl_div_coeff, ignore_index=IGNORE_INDEX):
    """Pure-JAX reference matching the PyTorch PACType2MLELoss forward."""
    ev = evidence.astype(jnp.float32)
    tg = targets.astype(jnp.float32)
    c = ev.shape[1]
    msk = (jnp.argmax(tg, axis=1) != ignore_index).astype(jnp.float32)
    alpha = ev + 1.0
    s = jnp.sum(alpha, axis=1, keepdims=True)
    pac = jnp.sum(tg * (jnp.log(s) - jnp.log(alpha)), axis=1)
    alpha_kl = tg + (1.0 - tg) * alpha
    akl_sum = jnp.sum(alpha_kl, axis=1, keepdims=True)
    kl_log = (jsp_special.gammaln(akl_sum)
              - jsp_special.gammaln(jnp.full_like(akl_sum, c))
              - jnp.sum(jsp_special.gammaln(alpha_kl), axis=1, keepdims=True))
    kl_dig = jnp.sum((alpha_kl - 1.0)
                     * (jsp_special.digamma(alpha_kl) - jsp_special.digamma(akl_sum)),
                     axis=1, keepdims=True)
    kl = jnp.squeeze(kl_log + kl_dig, axis=1)
    loss = (pac + kl_div_coeff * kl) * msk
    return jnp.sum(loss) / jnp.sum(msk)


if __name__ == "__main__":
    key = jax.random.PRNGKey(0)
    k_ev, k_lbl, k_ev2, k_lbl2 = jax.random.split(key, 4)
    kl_div_coeff = 0.1

    # Primary config: hw multiple of 128, default ignore_index -> fast (no mask/count) path.
    B, C, H, W = 2, 4, 16, 16
    evidence = jax.random.uniform(k_ev, (B, C, H, W), dtype=jnp.float32,
                                  minval=0.0, maxval=3.0)
    labels = jax.random.randint(k_lbl, (B, H, W), 0, C, dtype=jnp.int32)
    targets = jax.nn.one_hot(labels, C, axis=1, dtype=jnp.float32)

    loss = jax.block_until_ready(pac_type2_mle_loss(evidence, targets, kl_div_coeff))
    ref = jax.block_until_ready(_reference_loss(evidence, targets, kl_div_coeff))
    assert bool(jnp.isfinite(loss)), (loss, ref)
    assert jnp.allclose(loss, ref, rtol=1e-4, atol=2e-4), (loss, ref)

    # Secondary config: ragged hw + ignore_index is a valid class -> mask/count path.
    H2, W2 = 15, 15
    evidence2 = jax.random.uniform(k_ev2, (B, C, H2, W2), dtype=jnp.float32,
                                   minval=0.0, maxval=3.0)
    labels2 = jax.random.randint(k_lbl2, (B, H2, W2), 0, C, dtype=jnp.int32)
    targets2 = jax.nn.one_hot(labels2, C, axis=1, dtype=jnp.float32)

    loss2 = jax.block_until_ready(
        pac_type2_mle_loss(evidence2, targets2, kl_div_coeff, ignore_index=0))
    ref2 = jax.block_until_ready(
        _reference_loss(evidence2, targets2, kl_div_coeff, ignore_index=0))
    assert bool(jnp.isfinite(loss2)), (loss2, ref2)
    assert jnp.allclose(loss2, ref2, rtol=1e-4, atol=2e-4), (loss2, ref2)

    print("KERNEL_OK")
</pallas_src>

<mosaic_0001>
module attributes {stable_mosaic.version = 11 : i64} {
  func.func @_pac_kernel(%arg0: i32, %arg1: i32, %arg2: i32, %arg3: memref<1x1xf32, #tpu.memory_space<smem>>, %arg4: memref<1x4x2x128xf32, #tpu.memory_space<vmem>>, %arg5: memref<1x4x2x128xf32, #tpu.memory_space<vmem>>, %arg6: memref<1x1x1x1xf32, #tpu.memory_space<vmem>>, %arg7: memref<2x128xf32, #tpu.memory_space<vmem>>) attributes {dimension_semantics = [#tpu.dimension_semantics<parallel>, #tpu.dimension_semantics<parallel>, #tpu.dimension_semantics<arbitrary>], iteration_bounds = array<i64: 2, 1, 1>, scalar_prefetch = 0 : i64, scratch_operands = 1 : i64, tpu.core_type = #tpu.core_type<tc>, window_params = [{transform_indices = @transform_0, window_bounds = array<i64: 1, 1>}, {transform_indices = @transform_1, window_bounds = array<i64: 1, 4, 2, 128>}, {transform_indices = @transform_2, window_bounds = array<i64: 1, 4, 2, 128>}, {transform_indices = @transform_3, window_bounds = array<i64: 1, 1, 1, 1>}]} {
    %c0_i32 = arith.constant 0 : i32
    %0 = arith.cmpi eq, %arg2, %c0_i32 : i32
    %1 = arith.extui %0 : i1 to i32
    %c0_i32_0 = arith.constant 0 : i32
    %2 = arith.cmpi ne, %1, %c0_i32_0 : i32
    scf.if %2 {
      %cst_65 = arith.constant 0.000000e+00 : f32
      %170 = vector.broadcast %cst_65 : f32 to vector<2x128xf32>
      %c0_66 = arith.constant 0 : index
      %c0_67 = arith.constant 0 : index
      %171 = vector.load %arg7[%c0_66, %c0_67] : memref<2x128xf32, #tpu.memory_space<vmem>>, vector<2x128xf32>
      tpu.vector_store %arg7[%c0_66, %c0_67], %170 {strides = array<i32>} : memref<2x128xf32, #tpu.memory_space<vmem>>, vector<2x128xf32>,
    } else {
    }
    %c0 = arith.constant 0 : index
    %c0_1 = arith.constant 0 : index
    %c0_2 = arith.constant 0 : index
    %c0_3 = arith.constant 0 : index
    %3 = vector.load %arg4[%c0, %c0_1, %c0_2, %c0_3] : memref<1x4x2x128xf32, #tpu.memory_space<vmem>>, vector<1x4x2x128xf32>
    %4 = vector.shape_cast %3 : vector<1x4x2x128xf32> to vector<4x2x128xf32>
    %c0_4 = arith.constant 0 : index
    %c0_5 = arith.constant 0 : index
    %c0_6 = arith.constant 0 : index
    %c0_7 = arith.constant 0 : index
    %5 = vector.load %arg5[%c0_4, %c0_5, %c0_6, %c0_7] : memref<1x4x2x128xf32, #tpu.memory_space<vmem>>, vector<1x4x2x128xf32>
    %6 = vector.shape_cast %5 : vector<1x4x2x128xf32> to vector<4x2x128xf32>
    %c0_8 = arith.constant 0 : index
    %c0_9 = arith.constant 0 : index
    %7 = memref.load %arg3[%c0_8, %c0_9] : memref<1x1xf32, #tpu.memory_space<smem>>
    %cst = arith.constant 1.000000e+00 : f32
    %8 = vector.broadcast %cst : f32 to vector<4x2x128xf32>
    %9 = arith.addf %4, %8 : vector<4x2x128xf32>
    %cst_10 = arith.constant dense<0.000000e+00> : vector<2x128xf32>
    %10 = vector.multi_reduction <add>, %9, %cst_10 [0] : vector<4x2x128xf32> to vector<2x128xf32>
    %11 = math.log %9 : vector<4x2x128xf32>
    %cst_11 = arith.constant dense<0.000000e+00> : vector<2x128xf32>
    %12 = vector.multi_reduction <add>, %6, %cst_11 [0] : vector<4x2x128xf32> to vector<2x128xf32>
    %13 = math.log %10 : vector<2x128xf32>
    %14 = arith.mulf %12, %13 : vector<2x128xf32>
    %15 = arith.mulf %6, %11 : vector<4x2x128xf32>
    %cst_12 = arith.constant dense<0.000000e+00> : vector<2x128xf32>
    %16 = vector.multi_reduction <add>, %15, %cst_12 [0] : vector<4x2x128xf32> to vector<2x128xf32>
    %17 = arith.subf %14, %16 : vector<2x128xf32>
    %cst_13 = arith.constant 1.000000e+00 : f32
    %18 = vector.broadcast %cst_13 : f32 to vector<4x2x128xf32>
    %19 = arith.subf %18, %6 : vector<4x2x128xf32>
    %20 = arith.mulf %19, %9 : vector<4x2x128xf32>
    %21 = arith.addf %6, %20 : vector<4x2x128xf32>
    %cst_14 = arith.constant dense<0.000000e+00> : vector<2x128xf32>
    %22 = vector.multi_reduction <add>, %21, %cst_14 [0] : vector<4x2x128xf32> to vector<2x128xf32>
    %cst_15 = arith.constant 6.000000e+00 : f32
    %23 = vector.broadcast %cst_15 : f32 to vector<4x2x128xf32>
    %24 = arith.cmpf olt, %21, %23 : vector<4x2x128xf32>
    %cst_16 = arith.constant 1.000000e+00 : f32
    %25 = vector.broadcast %cst_16 : f32 to vector<4x2x128xf32>
    %26 = arith.select %24, %21, %25 : vector<4x2x128xi1>, vector<4x2x128xf32>
    %cst_17 = arith.constant 1.000000e+00 : f32
    %27 = vector.broadcast %cst_17 : f32 to vector<4x2x128xf32>
    %cst_18 = arith.constant 1.000000e+00 : f32
    %28 = vector.broadcast %cst_18 : f32 to vector<4x2x128xf32>
    %29 = arith.addf %26, %28 : vector<4x2x128xf32>
    %30 = arith.mulf %27, %29 : vector<4x2x128xf32>
    %31 = arith.addf %30, %26 : vector<4x2x128xf32>
    %32 = arith.mulf %26, %29 : vector<4x2x128xf32>
    %cst_19 = arith.constant 2.000000e+00 : f32
    %33 = vector.broadcast %cst_19 : f32 to vector<4x2x128xf32>
    %34 = arith.addf %26, %33 : vector<4x2x128xf32>
    %35 = arith.mulf %31, %34 : vector<4x2x128xf32>
    %36 = arith.addf %35, %32 : vector<4x2x128xf32>
    %37 = arith.mulf %32, %34 : vector<4x2x128xf32>
    %cst_20 = arith.constant 3.000000e+00 : f32
    %38 = vector.broadcast %cst_20 : f32 to vector<4x2x128xf32>
    %39 = arith.addf %26, %38 : vector<4x2x128xf32>
    %40 = arith.mulf %36, %39 : vector<4x2x128xf32>
    %41 = arith.addf %40, %37 : vector<4x2x128xf32>
    %42 = arith.mulf %37, %39 : vector<4x2x128xf32>
    %cst_21 = arith.constant 4.000000e+00 : f32
    %43 = vector.broadcast %cst_21 : f32 to vector<4x2x128xf32>
    %44 = arith.addf %26, %43 : vector<4x2x128xf32>
    %45 = arith.mulf %41, %44 : vector<4x2x128xf32>
    %46 = arith.addf %45, %42 : vector<4x2x128xf32>
    %47 = arith.mulf %42, %44 : vector<4x2x128xf32>
    %cst_22 = arith.constant 5.000000e+00 : f32
    %48 = vector.broadcast %cst_22 : f32 to vector<4x2x128xf32>
    %49 = arith.addf %21, %48 : vector<4x2x128xf32>
    %50 = arith.select %24, %49, %21 : vector<4x2x128xi1>, vector<4x2x128xf32>
    %cst_23 = arith.constant 1.000000e+00 : f32
    %51 = vector.broadcast %cst_23 : f32 to vector<4x2x128xf32>
    %52 = arith.divf %51, %50 : vector<4x2x128xf32>
    %53 = arith.mulf %52, %52 : vector<4x2x128xf32>
    %54 = math.log %50 : vector<4x2x128xf32>
    %cst_24 = arith.constant -5.95238118E-4 : f32
    %55 = vector.broadcast %cst_24 : f32 to vector<4x2x128xf32>
    %56 = arith.mulf %53, %55 : vector<4x2x128xf32>
    %cst_25 = arith.constant 7.93650805E-4 : f32
    %57 = vector.broadcast %cst_25 : f32 to vector<4x2x128xf32>
    %58 = arith.addf %57, %56 : vector<4x2x128xf32>
    %59 = arith.mulf %53, %58 : vector<4x2x128xf32>
    %cst_26 = arith.constant -0.00277777785 : f32
    %60 = vector.broadcast %cst_26 : f32 to vector<4x2x128xf32>
    %61 = arith.addf %60, %59 : vector<4x2x128xf32>
    %62 = arith.mulf %53, %61 : vector<4x2x128xf32>
    %cst_27 = arith.constant 0.0833333358 : f32
    %63 = vector.broadcast %cst_27 : f32 to vector<4x2x128xf32>
    %64 = arith.addf %63, %62 : vector<4x2x128xf32>
    %65 = arith.mulf %52, %64 : vector<4x2x128xf32>
    %cst_28 = arith.constant 0.0039682542 : f32
    %66 = vector.broadcast %cst_28 : f32 to vector<4x2x128xf32>
    %67 = arith.mulf %53, %66 : vector<4x2x128xf32>
    %cst_29 = arith.constant 0.00833333377 : f32
    %68 = vector.broadcast %cst_29 : f32 to vector<4x2x128xf32>
    %69 = arith.subf %68, %67 : vector<4x2x128xf32>
    %70 = arith.mulf %53, %69 : vector<4x2x128xf32>
    %cst_30 = arith.constant 0.0833333358 : f32
    %71 = vector.broadcast %cst_30 : f32 to vector<4x2x128xf32>
    %72 = arith.subf %71, %70 : vector<4x2x128xf32>
    %73 = arith.mulf %53, %72 : vector<4x2x128xf32>
    %cst_31 = arith.constant 5.000000e-01 : f32
    %74 = vector.broadcast %cst_31 : f32 to vector<4x2x128xf32>
    %75 = arith.subf %50, %74 : vector<4x2x128xf32>
    %76 = arith.mulf %75, %54 : vector<4x2x128xf32>
    %77 = arith.subf %76, %50 : vector<4x2x128xf32>
    %cst_32 = arith.constant 0.918938517 : f32
    %78 = vector.broadcast %cst_32 : f32 to vector<4x2x128xf32>
    %79 = arith.addf %77, %78 : vector<4x2x128xf32>
    %80 = arith.addf %79, %65 : vector<4x2x128xf32>
    %cst_33 = arith.constant 5.000000e-01 : f32
    %81 = vector.broadcast %cst_33 : f32 to vector<4x2x128xf32>
    %82 = arith.mulf %81, %52 : vector<4x2x128xf32>
    %83 = arith.subf %54, %82 : vector<4x2x128xf32>
    %84 = arith.subf %83, %73 : vector<4x2x128xf32>
    %85 = math.log %47 : vector<4x2x128xf32>
    %cst_34 = arith.constant 0.000000e+00 : f32
    %86 = vector.broadcast %cst_34 : f32 to vector<4x2x128xf32>
    %87 = arith.select %24, %85, %86 : vector<4x2x128xi1>, vector<4x2x128xf32>
    %88 = arith.subf %80, %87 : vector<4x2x128xf32>
    %89 = arith.divf %46, %47 : vector<4x2x128xf32>
    %cst_35 = arith.constant 0.000000e+00 : f32
    %90 = vector.broadcast %cst_35 : f32 to vector<4x2x128xf32>
    %91 = arith.select %24, %89, %90 : vector<4x2x128xi1>, vector<4x2x128xf32>
    %92 = arith.subf %84, %91 : vector<4x2x128xf32>
    %cst_36 = arith.constant 6.000000e+00 : f32
    %93 = vector.broadcast %cst_36 : f32 to vector<2x128xf32>
    %94 = arith.cmpf olt, %22, %93 : vector<2x128xf32>
    %cst_37 = arith.constant 1.000000e+00 : f32
    %95 = vector.broadcast %cst_37 : f32 to vector<2x128xf32>
    %96 = arith.select %94, %22, %95 : vector<2x128xi1>, vector<2x128xf32>
    %cst_38 = arith.constant 1.000000e+00 : f32
    %97 = vector.broadcast %cst_38 : f32 to vector<2x128xf32>
    %cst_39 = arith.constant 1.000000e+00 : f32
    %98 = vector.broadcast %cst_39 : f32 to vector<2x128xf32>
    %99 = arith.addf %96, %98 : vector<2x128xf32>
    %100 = arith.mulf %97, %99 : vector<2x128xf32>
    %101 = arith.addf %100, %96 : vector<2x128xf32>
    %102 = arith.mulf %96, %99 : vector<2x128xf32>
    %cst_40 = arith.constant 2.000000e+00 : f32
    %103 = vector.broadcast %cst_40 : f32 to vector<2x128xf32>
    %104 = arith.addf %22, %103 : vector<2x128xf32>
    %105 = arith.select %94, %104, %22 : vector<2x128xi1>, vector<2x128xf32>
    %cst_41 = arith.constant 1.000000e+00 : f32
    %106 = vector.broadcast %cst_41 : f32 to vector<2x128xf32>
    %107 = arith.divf %106, %105 : vector<2x128xf32>
    %108 = arith.mulf %107, %107 : vector<2x128xf32>
    %109 = math.log %105 : vector<2x128xf32>
    %cst_42 = arith.constant -5.95238118E-4 : f32
    %110 = vector.broadcast %cst_42 : f32 to vector<2x128xf32>
    %111 = arith.mulf %108, %110 : vector<2x128xf32>
    %cst_43 = arith.constant 7.93650805E-4 : f32
    %112 = vector.broadcast %cst_43 : f32 to vector<2x128xf32>
    %113 = arith.addf %112, %111 : vector<2x128xf32>
    %114 = arith.mulf %108, %113 : vector<2x128xf32>
    %cst_44 = arith.constant -0.00277777785 : f32
    %115 = vector.broadcast %cst_44 : f32 to vector<2x128xf32>
    %116 = arith.addf %115, %114 : vector<2x128xf32>
    %117 = arith.mulf %108, %116 : vector<2x128xf32>
    %cst_45 = arith.constant 0.0833333358 : f32
    %118 = vector.broadcast %cst_45 : f32 to vector<2x128xf32>
    %119 = arith.addf %118, %117 : vector<2x128xf32>
    %120 = arith.mulf %107, %119 : vector<2x128xf32>
    %cst_46 = arith.constant 0.0039682542 : f32
    %121 = vector.broadcast %cst_46 : f32 to vector<2x128xf32>
    %122 = arith.mulf %108, %121 : vector<2x128xf32>
    %cst_47 = arith.constant 0.00833333377 : f32
    %123 = vector.broadcast %cst_47 : f32 to vector<2x128xf32>
    %124 = arith.subf %123, %122 : vector<2x128xf32>
    %125 = arith.mulf %108, %124 : vector<2x128xf32>
    %cst_48 = arith.constant 0.0833333358 : f32
    %126 = vector.broadcast %cst_48 : f32 to vector<2x128xf32>
    %127 = arith.subf %126, %125 : vector<2x128xf32>
    %128 = arith.mulf %108, %127 : vector<2x128xf32>
    %cst_49 = arith.constant 5.000000e-01 : f32
    %129 = vector.broadcast %cst_49 : f32 to vector<2x128xf32>
    %130 = arith.subf %105, %129 : vector<2x128xf32>
    %131 = arith.mulf %130, %109 : vector<2x128xf32>
    %132 = arith.subf %131, %105 : vector<2x128xf32>
    %cst_50 = arith.constant 0.918938517 : f32
    %133 = vector.broadcast %cst_50 : f32 to vector<2x128xf32>
    %134 = arith.addf %132, %133 : vector<2x128xf32>
    %135 = arith.addf %134, %120 : vector<2x128xf32>
    %cst_51 = arith.constant 5.000000e-01 : f32
    %136 = vector.broadcast %cst_51 : f32 to vector<2x128xf32>
    %137 = arith.mulf %136, %107 : vector<2x128xf32>
    %138 = arith.subf %109, %137 : vector<2x128xf32>
    %139 = arith.subf %138, %128 : vector<2x128xf32>
    %140 = math.log %102 : vector<2x128xf32>
    %cst_52 = arith.constant 0.000000e+00 : f32
    %141 = vector.broadcast %cst_52 : f32 to vector<2x128xf32>
    %142 = arith.select %94, %140, %141 : vector<2x128xi1>, vector<2x128xf32>
    %143 = arith.subf %135, %142 : vector<2x128xf32>
    %144 = arith.divf %101, %102 : vector<2x128xf32>
    %cst_53 = arith.constant 0.000000e+00 : f32
    %145 = vector.broadcast %cst_53 : f32 to vector<2x128xf32>
    %146 = arith.select %94, %144, %145 : vector<2x128xi1>, vector<2x128xf32>
    %147 = arith.subf %139, %146 : vector<2x128xf32>
    %cst_54 = arith.constant 1.79175949 : f32
    %148 = vector.broadcast %cst_54 : f32 to vector<2x128xf32>
    %149 = arith.subf %143, %148 : vector<2x128xf32>
    %cst_55 = arith.constant dense<0.000000e+00> : vector<2x128xf32>
    %150 = vector.multi_reduction <add>, %88, %cst_55 [0] : vector<4x2x128xf32> to vector<2x128xf32>
    %151 = arith.subf %149, %150 : vector<2x128xf32>
    %cst_56 = arith.constant 1.000000e+00 : f32
    %152 = vector.broadcast %cst_56 : f32 to vector<4x2x128xf32>
    %153 = arith.subf %21, %152 : vector<4x2x128xf32>
    %154 = arith.mulf %153, %92 : vector<4x2x128xf32>
    %cst_57 = arith.constant dense<0.000000e+00> : vector<2x128xf32>
    %155 = vector.multi_reduction <add>, %154, %cst_57 [0] : vector<4x2x128xf32> to vector<2x128xf32>
    %cst_58 = arith.constant 4.000000e+00 : f32
    %156 = vector.broadcast %cst_58 : f32 to vector<2x128xf32>
    %157 = arith.subf %22, %156 : vector<2x128xf32>
    %158 = arith.mulf %157, %147 : vector<2x128xf32>
    %159 = arith.subf %155, %158 : vector<2x128xf32>
    %160 = arith.addf %151, %159 : vector<2x128xf32>
    %161 = vector.broadcast %7 : f32 to vector<2x128xf32>
    %162 = arith.mulf %161, %160 : vector<2x128xf32>
    %163 = arith.addf %17, %162 : vector<2x128xf32>
    %c0_59 = arith.constant 0 : index
    %c0_60 = arith.constant 0 : index
    %164 = vector.load %arg7[%c0_59, %c0_60] : memref<2x128xf32, #tpu.memory_space<vmem>>, vector<2x128xf32>
    %165 = arith.addf %164, %163 : vector<2x128xf32>
    %c0_61 = arith.constant 0 : index
    %c0_62 = arith.constant 0 : index
    %166 = vector.load %arg7[%c0_61, %c0_62] : memref<2x128xf32, #tpu.memory_space<vmem>>, vector<2x128xf32>
    tpu.vector_store %arg7[%c0_61, %c0_62], %165 {strides = array<i32>} : memref<2x128xf32, #tpu.memory_space<vmem>>, vector<2x128xf32>,
    %c0_i32_63 = arith.constant 0 : i32
    %167 = arith.cmpi eq, %arg2, %c0_i32_63 : i32
    %168 = arith.extui %167 : i1 to i32
    %c0_i32_64 = arith.constant 0 : i32
    %169 = arith.cmpi ne, %168, %c0_i32_64 : i32
    scf.if %169 {
      %c0_65 = arith.constant 0 : index
      %c0_66 = arith.constant 0 : index
      %170 = vector.load %arg7[%c0_65, %c0_66] : memref<2x128xf32, #tpu.memory_space<vmem>>, vector<2x128xf32>
      %171 = vector.shape_cast %170 : vector<2x128xf32> to vector<1x2x128xf32>
      %cst_67 = arith.constant dense<0.000000e+00> : vector<1xf32>
      %172 = vector.multi_reduction <add>, %171, %cst_67 [1, 2] : vector<1x2x128xf32> to vector<1xf32>
      %173 = vector.shape_cast %172 : vector<1xf32> to vector<1x1x1xf32>
      %174 = vector.extract %173[0, 0, 0] : f32 from vector<1x1x1xf32>
      %175 = vector.broadcast %174 : f32 to vector<1x1xf32>
      %c0_68 = arith.constant 0 : index
      %c0_69 = arith.constant 0 : index
      %c0_70 = arith.constant 0 : index
      %c0_71 = arith.constant 0 : index
      %176 = vector.load %arg6[%c0_68, %c0_69, %c0_70, %c0_71] : memref<1x1x1x1xf32, #tpu.memory_space<vmem>>, vector<1x1x1x1xf32>
      %177 = vector.shape_cast %176 : vector<1x1x1x1xf32> to vector<1x1xf32>
      %178 = vector.shape_cast %175 : vector<1x1xf32> to vector<1x1x1x1xf32>
      tpu.vector_store %arg6[%c0_68, %c0_69, %c0_70, %c0_71], %178 {strides = array<i32>} : memref<1x1x1x1xf32, #tpu.memory_space<vmem>>, vector<1x1x1x1xf32>,
    } else {
    }
    return
  }
  func.func @transform_0(%arg0: i32, %arg1: i32, %arg2: i32) -> (i32, i32) {
    %c0_i32 = arith.constant 0 : i32
    %c0_i32_0 = arith.constant 0 : i32
    %c0_i32_1 = arith.constant 0 : i32
    return %c0_i32, %c0_i32_0 : i32, i32
  }
  func.func @transform_1(%arg0: i32, %arg1: i32, %arg2: i32) -> (i32, i32, i32, i32) {
    %c1_i32 = arith.constant 1 : i32
    %0 = arith.muli %arg1, %c1_i32 : i32
    %1 = arith.addi %0, %arg2 : i32
    %c0_i32 = arith.constant 0 : i32
    %c0_i32_0 = arith.constant 0 : i32
    %c0_i32_1 = arith.constant 0 : i32
    return %arg0, %c0_i32, %1, %c0_i32_0 : i32, i32, i32, i32
  }
  func.func @transform_2(%arg0: i32, %arg1: i32, %arg2: i32) -> (i32, i32, i32, i32) {
    %c1_i32 = arith.constant 1 : i32
    %0 = arith.muli %arg1, %c1_i32 : i32
    %1 = arith.addi %0, %arg2 : i32
    %c0_i32 = arith.constant 0 : i32
    %c0_i32_0 = arith.constant 0 : i32
    %c0_i32_1 = arith.constant 0 : i32
    return %arg0, %c0_i32, %1, %c0_i32_0 : i32, i32, i32, i32
  }
  func.func @transform_3(%arg0: i32, %arg1: i32, %arg2: i32) -> (i32, i32, i32, i32) {
    %c0_i32 = arith.constant 0 : i32
    %c0_i32_0 = arith.constant 0 : i32
    %c0_i32_1 = arith.constant 0 : i32
    return %arg0, %arg1, %c0_i32, %c0_i32_0 : i32, i32, i32, i32
  }
}

</mosaic_0001>

<bundles_post_ra>
// kernel: tpu_custom_call.1
= control target key start
LH: loop header
LB: loop body
LE: loop exit
PB: predicated region body
PF: predicated region fallthrough
CT: control target
= control target key end

     0   :  { %s1494_s0 = inlined_call_operand.<no memory space> [shape: f32[1,1], index: 0, kind: input, shape index: {}]   ;;  %s1495_s1 = inlined_call_operand.hbm [shape: f32[2,4,2,128], index: 1, kind: input, shape index: {}]   ;;  %s1496_s2 = inlined_call_operand.hbm [shape: f32[2,4,2,128], index: 2, kind: input, shape index: {}]   ;;  %s1497_s3 = inlined_call_operand.vmem [shape: f32[2,1,1,1], index: 3, kind: output, shape index: {}]  }
   0x1   :  { %8 = sst [smem:[#allocation3]] %s1494_s0 }
   0x2   :  { %9 = vsyncpa [#allocation5], 0 }
   0x3   :  { %11 = vsyncpa [#allocation5 + $0x1], 0 }
   0x4   :  { %12 = vsyncpa [#allocation7], 0 }
   0x5   :  { %14 = vsyncpa [#allocation7 + $0x1], 0  ;;  %s1035_s14 = smov 0   ;;  %s1037_s15 = smov 0  }
   0x6   :  { %s1039_s16 = smov 0   ;;  %s1041_s17 = smov 0  }
   0x7   :  { %s1043_s18 = smov 0   ;;  %s1045_s19 = smov 0  }
   0x8 LB: > { %s752_s0 = sadd.s32 4294967295, %s1005_s19   ;;  %s39_s20 = sadd.s32 1, %s1001_s18  ;;  %s1005_s19 = sphi %s1045_s19, %s20_s19   ;;  %s1001_s18 = sphi %s1043_s18, %s1531_s18   ;;  %s997_s17 = sphi %s1041_s17, %s1530_s17   ;;  %s993_s16 = sphi %s1039_s16, %s1529_s16   ;;  %s989_s15 = sphi %s1037_s15, %s1528_s15   ;;  %s985_s14 = sphi %s1035_s14, %s1527_s14  }
   0x9   : > { %p41_p0 = scmp.ge.s32.totalorder %s39_s20, 2  ;;  %s71_s21 = sadd.s32 1, %s993_s16 }
   0xa   : > { %p78_p1 = scmp.ne.s32.totalorder %s993_s16, %s989_s15  ;;  %p79_p2 = scmp.eq.s32.totalorder %s1005_s19, 0 }
   0xb   : > { %s1533_s20 = smov (%p41_p0, %s39_s20), 0  ;;  %p84_p4 = scmp.ne.s32.totalorder %s989_s15, %s985_s14 }
   0xc   : > { %p1071_p3 = por %p79_p2, %p78_p1  ;;  %s66_s23 = ssub.s32 %s1001_s18, %s1533_s20 }
   0xd   : > { %p85_p5 = scmp.eq.s32.totalorder %s752_s0, 0  ;;  %p69_p6 = scmp.eq.s32.totalorder %s66_s23, 0 }
   0xe   : > { %p793_p8 = scmp.lt.s32.totalorder %s1005_s19, 2  ;;  %s1087_s26 = sand.u32 1, %s993_s16  }
   0xf   : > { %p1078_p7 = por %p85_p5, %p84_p4  ;;  %s778_s27 = sshll.u32 %s1001_s18, 7 }
  0x10   : > { %s1084_s25 = scalar_select %p69_p6, %s993_s16, %s71_s21  }
  0x11   : > { %s756_s28 = sshll.u32 %s1087_s26, 3  ;;  %s181_s4 = scalar_lea.hbm %s1495_s1, %s778_s27 }
  0x12   : > { %s173_s5 = scalar_lea.vmem [#allocation4], %s756_s28  ;;  %p1098_p9 = pnand %p793_p8, %p1071_p3 }
  0x13   : > { %s182_s6 = sshll.u32 %s173_s5, 4  ;;  %s170_s8 = scalar_lea.sflag [#allocation5], %s1087_s26  ;;  %s183_s6 = int_to_ptr.vmem [resolvable:$true] %s182_s6 }
  0x14   : > { %p897_p10 = pneg %p1098_p9  ;;  %s908_s9 = scalar_lea.vmem %s183_s6, 128 }
  0x15   : > { %p909_p11 = scmp.ne.s32.totalorder %s183_s6, %s908_s9  ;;  %s1007_s10 = smov [#allocation4]  }
  0x16   : > { %s913_s11 = sshll.u32 %s1007_s10, 4  ;;  %s914_s11 = int_to_ptr.vmem [resolvable:$false] %s913_s11 }
  0x17   : > { %p911_p12 = pnand %p909_p11, %p897_p10  ;;  %s915_s12 = scalar_lea.vmem %s914_s11, 256 }
  0x18   : > { %p916_p0 = scmp.lt.s32.totalorder %s183_s6, %s914_s11  ;;  %p917_p1 = scmp.lt.s32.totalorder %s915_s12, %s908_s9 }
  0x19   : > { %p912_p13 = pneg %p911_p12 }
  0x1a   : > { %p918_p2 = por %p917_p1, %p916_p0 }
  0x1c   : > { %p919_p3 = pnand %p918_p2, %p912_p13 }
  0x1e   : > { %922 = shalt.err (!%p919_p3)
}
  0x1f   : > { %s1008_s13 = smov 32   ;;  %s1009_s14 = smov 2  }
  0x20   : > { %789 = dma.hbm_to_vmem [thread:$0]  (!%p1098_p9), %s181_s4, 128, %s183_s6, %s170_s8, %s1008_s13, %s1008_s13, %s1009_s14  }
  0x21   : > { %p762_p4 = scmp.ge.s32.totalorder %s1005_s19, 1  ;;  %p213_p5 = scmp.lt.s32.totalorder %s1005_s19, 3 }
  0x22   : > { %s204_s23 = scalar_lea.hbm %s1496_s2, %s778_s27  ;;  %s196_s29 = scalar_lea.vmem [#allocation6], %s756_s28 }
  0x23   : > { %p1112_p6 = pnand %p762_p4, %p213_p5  ;;  %s205_s30 = sshll.u32 %s196_s29, 4  ;;  %s206_s30 = int_to_ptr.vmem [resolvable:$true] %s205_s30 }
  0x24   : > { %s193_s5 = scalar_lea.sflag [#allocation7], %s1087_s26  ;;  %s936_s9 = scalar_lea.vmem %s206_s30, 128 }
  0x25   : > { %p937_p8 = scmp.ne.s32.totalorder %s206_s30, %s936_s9  ;;  %s1010_s4 = smov [#allocation6]  }
  0x26   : > { %s941_s6 = sshll.u32 %s1010_s4, 4  ;;  %s942_s6 = int_to_ptr.vmem [resolvable:$false] %s941_s6 }
  0x27   : > { %p939_p11 = pnand %p937_p8, %p897_p10  ;;  %s943_s8 = scalar_lea.vmem %s942_s6, 256 }
  0x28   : > { %p944_p13 = scmp.lt.s32.totalorder %s206_s30, %s942_s6  ;;  %p945_p0 = scmp.lt.s32.totalorder %s943_s8, %s936_s9 }
  0x29   : > { %p940_p12 = pneg %p939_p11 }
  0x2a   : > { %p946_p1 = por %p945_p0, %p944_p13 }
  0x2c   : > { %p947_p2 = pnand %p946_p1, %p940_p12 }
  0x2e   : > { %950 = shalt.err (!%p947_p2)
}
  0x2f   : > { %792 = dma.hbm_to_vmem [thread:$0]  (!%p1098_p9), %s204_s23, 128, %s206_s30, %s193_s5, %s1008_s13, %s1008_s13, %s1009_s14  }
  0x30   : > { %217 = sbr.rel (%p1112_p6) target bundleno = 369 (0x171), region = 32 }
  0x35   : > { %s219_s26 = sand.u32 1, %s989_s15  }
  0x36   : > { %s763_s27 = sshll.u32 %s219_s26, 3  ;;  %s220_s28 = scalar_lea.sflag [#allocation5], %s219_s26 }
  0x37   : > { %s223_s10 = scalar_lea.vmem [#allocation4], %s763_s27 }
  0x38   : > { %976 = dma.done.wait (%p1078_p7), %s220_s28, 128  }
  0x39   : > { %978 = vsyncadd (%p1078_p7), %s220_s28, 4294967168  ;;  %s229_s11 = scalar_lea.sflag [#allocation7], %s219_s26  ;;  %s232_s12 = scalar_lea.vmem [#allocation6], %s763_s27 }
  0x3a   : > { %980 = dma.done.wait (%p1078_p7), %s229_s11, 128  }
  0x3b   : > { %982 = vsyncadd (%p1078_p7), %s229_s11, 4294967168  ;;  %v1011_v0 = vmov 0.0   ;;  %v274_v1 = vld [vmem:[%s223_s10] sm:$0x3]  ;;  %v1138_v2 = vld [vmem:[%s232_s12] sm:$0x3] }
  0x3c   : > { %273 = vst [vmem:[#allocation2] sm:$0x3] %v1011_v0  ;;  %v275_v3 = vld [vmem:[%s223_s10 + $0x2] sm:$0x3]  ;;  %v276_v4 = vld [vmem:[%s223_s10 + $0x4] sm:$0x3] }
  0x3d   : > { %v1140_v5 = vld [vmem:[%s232_s12 + $0x2] sm:$0x3]  ;;  %v277_v6 = vld [vmem:[%s223_s10 + $0x6] sm:$0x3]  ;;  %v1142_v7 = vld [vmem:[%s232_s12 + $0x4] sm:$0x3] }
  0x3e   : > { %1507 = vst [vmem:[#allocation10_spill] sm:$0xff] %v1142_v7  ;;  %v1144_v8 = vld [vmem:[%s232_s12 + $0x6] sm:$0x3]  ;;  %v283_v9 = vadd.f32 1.0, %v274_v1  ;;  %v325_v10 = vsub.f32 1.0, %v1138_v2  ;;  %v284_v11 = vadd.f32 1.0, %v275_v3 }
  0x3f   : > { %1508 = vst [vmem:[#allocation11_spill] sm:$0xff] %v1144_v8  ;;  %v326_v12 = vsub.f32 1.0, %v1140_v5  ;;  %v285_v13 = vadd.f32 1.0, %v276_v4  ;;  %v286_v14 = vadd.f32 1.0, %v277_v6  ;;  %v327_v15 = vsub.f32 1.0, %v1142_v7  ;;  %s282_s24 = sld [smem:[#allocation3]] }
  0x40   : > { %v328_v16 = vsub.f32 1.0, %v1144_v8  ;;  %v329_v17 = vmul.f32 %v325_v10, %v283_v9  ;;  %vm287_vm4 = vcmask 1041408   ;;  %845 = vlog2.f32 %v283_v9  ;;  %p263_p7 = scmp.lt.s32.totalorder %s997_s17, 1 }
  0x41   : > { %v330_v18 = vmul.f32 %v326_v12, %v284_v11  ;;  %v331_v19 = vmul.f32 %v327_v15, %v285_v13  ;;  %v288_v29 = vsel %vm287_vm4, %v283_v9, 0.0  ;;  %v289_v30 = vsel %vm287_vm4, %v284_v11, 0.0 }
  0x42   : > { %v332_v20 = vmul.f32 %v328_v16, %v286_v14  ;;  %v1151_v21 = vadd.f32 %v329_v17, %v1138_v2  ;;  %v290_v36 = vadd.f32 %v289_v30, %v288_v29  ;;  %v291_v38 = vsel %vm287_vm4, %v285_v13, 0.0  ;;  %s1535_s17 = smov (!%p263_p7, %s997_s17), 1 }
  0x43   : > { %v1154_v22 = vadd.f32 %v330_v18, %v1140_v5  ;;  %v1157_v23 = vadd.f32 %v331_v19, %v1142_v7  ;;  %847 = vlog2.f32 %v284_v11  ;;  %v293_v49 = vsel %vm287_vm4, %v286_v14, 0.0  ;;  %s268_s14 = scalar_lea.vmem %s1497_s3, %s1535_s17 }
  0x44   : > { %v1160_v24 = vadd.f32 %v332_v20, %v1144_v8  ;;  %vm344_vm0 = vcmp.lt.f32.partialorder %v1151_v21, 6.0  ;;  %v337_v42 = vsel %vm287_vm4, %v1151_v21, 0.0  ;;  %v292_v48 = vadd.f32 %v291_v38, %v290_v36 }
  0x45   : > { %vm345_vm1 = vcmp.lt.f32.partialorder %v1154_v22, 6.0  ;;  %v1167_v25 = vsel %vm344_vm0, %v1151_v21, 1.0  ;;  %vm346_vm2 = vcmp.lt.f32.partialorder %v1157_v23, 6.0  ;;  %v338_v43 = vsel %vm287_vm4, %v1154_v22, 0.0 }
  0x46   : > { %vm347_vm3 = vcmp.lt.f32.partialorder %v1160_v24, 6.0  ;;  %v1174_v26 = vsel %vm345_vm1, %v1154_v22, 1.0  ;;  %v1179_v27 = vsel %vm346_vm2, %v1157_v23, 1.0  ;;  %v352_v31 = vadd.f32 1.0, %v1167_v25 }
  0x47   : > { %v1184_v28 = vsel %vm347_vm3, %v1160_v24, 1.0  ;;  %v353_v32 = vadd.f32 1.0, %v1174_v26  ;;  %v354_v33 = vadd.f32 1.0, %v1179_v27  ;;  %v364_v41 = vadd.f32 2.0, %v1167_v25 }
  0x48   : > { %v355_v34 = vadd.f32 1.0, %v1184_v28  ;;  %v356_v35 = vadd.f32 %v352_v31, %v1167_v25  ;;  %v365_v44 = vadd.f32 2.0, %v1174_v26  ;;  %v366_v45 = vadd.f32 2.0, %v1179_v27 }
  0x49   : > { %v357_v37 = vadd.f32 %v353_v32, %v1174_v26  ;;  %v358_v39 = vadd.f32 %v354_v33, %v1179_v27  ;;  %v367_v46 = vadd.f32 2.0, %v1184_v28  ;;  %849 = vlog2.f32 %v285_v13 }
  0x4a   : > { %v359_v40 = vadd.f32 %v355_v34, %v1184_v28  ;;  %v368_v47 = vmul.f32 %v364_v41, %v356_v35  ;;  %v339_v51 = vadd.f32 %v338_v43, %v337_v42  ;;  %v360_v52 = vmul.f32 %v352_v31, %v1167_v25 }
  0x4b   : > { %v369_v50 = vmul.f32 %v365_v44, %v357_v37  ;;  %v370_v53 = vmul.f32 %v366_v45, %v358_v39  ;;  %851 = vlog2.f32 %v286_v14  ;;  %v340_v55 = vsel %vm287_vm4, %v1157_v23, 0.0 }
  0x4c   : > { %v371_v54 = vmul.f32 %v367_v46, %v359_v40  ;;  %v361_v56 = vmul.f32 %v353_v32, %v1174_v26  ;;  %v362_v57 = vmul.f32 %v354_v33, %v1179_v27  ;;  %v363_v58 = vmul.f32 %v355_v34, %v1184_v28 }
  0x4d   : > { %v372_v59 = vadd.f32 %v368_v47, %v360_v52  ;;  %v412_v60 = vadd.f32 5.0, %v1151_v21  ;;  %v294_v61 = vadd.f32 %v293_v49, %v292_v48  ;;  %v303_v62 = vsel %vm287_vm4, %v1138_v2, 0.0  ;;  %v846_v20 = vpop.eup %845 }
  0x4e   : > { %v304_v63 = vsel %vm287_vm4, %v1140_v5, 0.0  ;;  %v373_v0 = vadd.f32 %v369_v50, %v361_v56  ;;  %v341_v1 = vadd.f32 %v340_v55, %v339_v51  ;;  %v374_v3 = vadd.f32 %v370_v53, %v362_v57 }
  0x4f   : > { %v375_v4 = vadd.f32 %v371_v54, %v363_v58  ;;  %v380_v6 = vadd.f32 3.0, %v1167_v25  ;;  %v381_v9 = vadd.f32 3.0, %v1174_v26  ;;  %v382_v10 = vadd.f32 3.0, %v1179_v27 }
  0x50   : > { %v413_v11 = vadd.f32 5.0, %v1154_v22  ;;  %v414_v12 = vadd.f32 5.0, %v1157_v23  ;;  %v383_v13 = vadd.f32 3.0, %v1184_v28  ;;  %v415_v15 = vadd.f32 5.0, %v1160_v24  ;;  %v848_v35 = vpop.eup %847 }
  0x51   : > { %v384_v14 = vmul.f32 %v380_v6, %v372_v59  ;;  %v1227_v16 = vsel %vm344_vm0, %v412_v60, %v1151_v21  ;;  %v385_v17 = vmul.f32 %v381_v9, %v373_v0  ;;  %v386_v29 = vmul.f32 %v382_v10, %v374_v3 }
  0x52   : > { %v1232_v18 = vsel %vm345_vm1, %v413_v11, %v1154_v22  ;;  %v1237_v19 = vsel %vm346_vm2, %v414_v12, %v1157_v23  ;;  %853 = vrcp.f32 %v1227_v16  ;;  %v387_v30 = vmul.f32 %v383_v13, %v375_v4 }
  0x53   : > { %v1243_v31 = vsel %vm347_vm3, %v415_v15, %v1160_v24  ;;  %855 = vrcp.f32 %v1232_v18  ;;  %v342_v32 = vsel %vm287_vm4, %v1160_v24, 0.0  ;;  %v376_v33 = vmul.f32 %v364_v41, %v360_v52 }
  0x54   : > { %v377_v34 = vmul.f32 %v365_v44, %v361_v56  ;;  %857 = vrcp.f32 %v1237_v19  ;;  %v1249_v36 = vadd.f32 %v304_v63, %v303_v62  ;;  %v378_v37 = vmul.f32 %v366_v45, %v362_v57 }
  0x55   : > { %v379_v38 = vmul.f32 %v367_v46, %v363_v58  ;;  %859 = vrcp.f32 %v1243_v31  ;;  %v1254_v39 = vsel %vm287_vm4, %v1142_v7, 0.0  ;;  %v388_v40 = vadd.f32 %v384_v14, %v376_v33 }
  0x56   : > { %1509 = vst [vmem:[#allocation12_spill] sm:$0xff] %v1249_v36  ;;  %1510 = vst [vmem:[#allocation13_spill] sm:$0xff] %v1254_v39  ;;  %861 = vlog2.f32 %v294_v61  ;;  %v389_v42 = vadd.f32 %v385_v17, %v377_v34  ;;  %v850_v43 = vpop.eup %849  ;;  %v296_v47 = vmul.f32 0.6931472, %v846_v20  ;;  %v1256_v41 = vadd.f32 %v342_v32, %v341_v1 }
  0x57   : > { %v390_v44 = vadd.f32 %v386_v29, %v378_v37  ;;  %v391_v48 = vadd.f32 %v387_v30, %v379_v38  ;;  %v298_v49 = vmul.f32 0.6931472, %v848_v35  ;;  %v392_v50 = vmul.f32 %v380_v6, %v376_v33 }
  0x58   : > { %1511 = vst [vmem:[#allocation14_spill] sm:$0xff] %v1256_v41  ;;  %v396_v45 = vadd.f32 4.0, %v1167_v25  ;;  %v397_v46 = vadd.f32 4.0, %v1174_v26  ;;  %v852_v51 = vpop.eup %851  ;;  %v393_v52 = vmul.f32 %v381_v9, %v377_v34  ;;  %v394_v53 = vmul.f32 %v382_v10, %v378_v37 }
  0x59   : > { %v398_v54 = vadd.f32 4.0, %v1179_v27  ;;  %v399_v55 = vadd.f32 4.0, %v1184_v28  ;;  %v395_v56 = vmul.f32 %v383_v13, %v379_v38  ;;  %863 = vlog2.f32 %v1227_v16 }
  0x5a   : > { %v400_v57 = vmul.f32 %v396_v45, %v388_v40  ;;  %v401_v58 = vmul.f32 %v397_v46, %v389_v42  ;;  %v1263_v59 = vmul.f32 0.6931472, %v850_v43  ;;  %865 = vlog2.f32 %v1232_v18 }
  0x5b   : > { %v402_v60 = vmul.f32 %v398_v54, %v390_v44  ;;  %v403_v61 = vmul.f32 %v399_v55, %v391_v48  ;;  %v1266_v25 = vmul.f32 0.6931472, %v852_v51  ;;  %v1269_v26 = vmul.f32 %v296_v47, %v1138_v2 }
  0x5c   : > { %1512 = vst [vmem:[#allocation15_spill] sm:$0xff] %v1263_v59  ;;  %v1272_v27 = vmul.f32 %v298_v49, %v1140_v5  ;;  %867 = vlog2.f32 %v1237_v19  ;;  %v408_v28 = vmul.f32 %v396_v45, %v392_v50  ;;  %v409_v62 = vmul.f32 %v397_v46, %v393_v52 }
  0x5d   : > { %1513 = vst [vmem:[#allocation16_spill] sm:$0xff] %v1266_v25  ;;  %1514 = vst [vmem:[#allocation17_spill] sm:$0xff] %v1269_v26  ;;  %v410_v63 = vmul.f32 %v398_v54, %v394_v53  ;;  %869 = vlog2.f32 %v1243_v31  ;;  %v1276_v0 = vadd.f32 %v400_v57, %v392_v50  ;;  %v1278_v1 = vadd.f32 %v401_v58, %v393_v52 }
  0x5e   : > { %1515 = vst [vmem:[#allocation18_spill] sm:$0xff] %v1272_v27  ;;  %v1280_v3 = vmul.f32 %v399_v55, %v395_v56  ;;  %vm552_vm5 = vcmp.lt.f32.partialorder %v1256_v41, 6.0  ;;  %v1285_v4 = vadd.f32 %v402_v60, %v394_v53  ;;  %v1287_v5 = vadd.f32 %v403_v61, %v395_v56 }
  0x5f   : > { %v1283_v2 = vpop.eup %853  ;;  %v1290_v6 = vadd.f32 -0.5, %v1227_v16  ;;  %v1295_v9 = vsel %vm552_vm5, %v1256_v41, 1.0  ;;  %v1304_v12 = vadd.f32 -0.5, %v1232_v18  ;;  %v1307_v13 = vadd.f32 -0.5, %v1237_v19 }
  0x60   : > { %v1297_v10 = vpop.eup %855  ;;  %v1301_v11 = vmul.f32 %v1283_v2, %v1283_v2  ;;  %v1310_v14 = vadd.f32 -0.5, %v1243_v31  ;;  %v557_v20 = vadd.f32 2.0, %v1256_v41  ;;  %v1320_v29 = vadd.f32 -1.0, %v1151_v21 }
  0x61   : > { %v1312_v15 = vpop.eup %857  ;;  %v1316_v17 = vmul.f32 %v1297_v10, %v1297_v10  ;;  %v1323_v30 = vadd.f32 -1.0, %v1154_v22  ;;  %871 = vlog2.f32 %v408_v28  ;;  %v1333_v35 = vadd.f32 1.0, %v1295_v9 }
  0x62   : > { %v1325_v32 = vpop.eup %859  ;;  %v1329_v33 = vmul.f32 %v1312_v15, %v1312_v15  ;;  %v440_v34 = vmul.f32 -0.0005952381, %v1301_v11  ;;  %v468_v42 = vmul.f32 0.003968254, %v1301_v11  ;;  %873 = vlog2.f32 %v409_v62 }
  0x63   : > { %v1335_v37 = vpop.eup %861  ;;  %v1339_v38 = vmul.f32 %v1325_v32, %v1325_v32  ;;  %v441_v40 = vmul.f32 -0.0005952381, %v1316_v17  ;;  %v469_v44 = vmul.f32 0.003968254, %v1316_v17  ;;  %875 = vlog2.f32 %v410_v63 }
  0x64   : > { %1516 = vst [vmem:[#allocation19_spill] sm:$0xff] %v1335_v37  ;;  %v442_v43 = vmul.f32 -0.0005952381, %v1329_v33  ;;  %v444_v47 = vadd.f32 0.0007936508, %v440_v34  ;;  %877 = vlog2.f32 %v1280_v3  ;;  %v1350_v50 = vsel %vm552_vm5, %v557_v20, %v1256_v41 }
  0x65   : > { %v443_v48 = vmul.f32 -0.0005952381, %v1339_v38  ;;  %v445_v49 = vadd.f32 0.0007936508, %v441_v40  ;;  %v470_v51 = vmul.f32 0.003968254, %v1329_v33  ;;  %879 = vrcp.f32 %v408_v28 }
  0x66   : > { %v446_v45 = vadd.f32 0.0007936508, %v442_v43  ;;  %v448_v46 = vmul.f32 %v444_v47, %v1301_v11  ;;  %v864_v52 = vpop.eup %863  ;;  %v471_v55 = vmul.f32 0.003968254, %v1339_v38  ;;  %881 = vrcp.f32 %v409_v62 }
  0x67   : > { %v447_v53 = vadd.f32 0.0007936508, %v443_v48  ;;  %v449_v54 = vmul.f32 %v445_v49, %v1316_v17  ;;  %v866_v56 = vpop.eup %865  ;;  %v472_v58 = vsub.f32 0.008333334, %v468_v42  ;;  %v473_v60 = vsub.f32 0.008333334, %v469_v44 }
  0x68   : > { %v450_v57 = vmul.f32 %v446_v45, %v1329_v33  ;;  %883 = vrcp.f32 %v410_v63  ;;  %v452_v34 = vadd.f32 -0.0027777778, %v448_v46  ;;  %v474_v40 = vsub.f32 0.008333334, %v470_v51 }
  0x69   : > { %v868_v61 = vpop.eup %867  ;;  %v451_v20 = vmul.f32 %v447_v53, %v1339_v38  ;;  %885 = vrcp.f32 %v1350_v50  ;;  %v453_v43 = vadd.f32 -0.0027777778, %v449_v54  ;;  %v475_v48 = vsub.f32 0.008333334, %v471_v55 }
  0x6a   : > { %v870_v28 = vpop.eup %869  ;;  %v454_v47 = vadd.f32 -0.0027777778, %v450_v57  ;;  %v476_v49 = vmul.f32 %v472_v58, %v1301_v11  ;;  %887 = vlog2.f32 %v1350_v50  ;;  %v1362_v42 = vadd.f32 -0.5, %v1350_v50 }
  0x6b   : > { %v455_v62 = vadd.f32 -0.0027777778, %v451_v20  ;;  %v1365_v63 = vadd.f32 -1.0, %v1157_v23  ;;  %v433_v44 = vmul.f32 0.6931472, %v864_v52  ;;  %v477_v51 = vmul.f32 %v473_v60, %v1316_v17 }
  0x6c   : > { %v435_v45 = vmul.f32 0.6931472, %v866_v56  ;;  %v437_v46 = vmul.f32 0.6931472, %v868_v61  ;;  %v1368_v53 = vmul.f32 0.6931472, %v870_v28  ;;  %v456_v54 = vmul.f32 %v452_v34, %v1301_v11 }
  0x6d   : > { %v478_v55 = vmul.f32 %v474_v40, %v1329_v33  ;;  %889 = vrcp.f32 %v1280_v3  ;;  %v457_v57 = vmul.f32 %v453_v43, %v1316_v17  ;;  %v458_v58 = vmul.f32 %v454_v47, %v1329_v33 }
  0x6e   : > { %v479_v20 = vmul.f32 %v475_v48, %v1339_v38  ;;  %v480_v41 = vsub.f32 0.083333336, %v476_v49  ;;  %v872_v52 = vpop.eup %871  ;;  %v459_v56 = vmul.f32 %v455_v62, %v1339_v38  ;;  %v508_v60 = vmul.f32 0.5, %v1283_v2 }
  0x6f   : > { %v509_v61 = vmul.f32 0.5, %v1297_v10  ;;  %v510_v34 = vmul.f32 0.5, %v1312_v15  ;;  %v874_v28 = vpop.eup %873  ;;  %v481_v40 = vsub.f32 0.083333336, %v477_v51  ;;  %v492_v3 = vmul.f32 %v1290_v6, %v433_v44 }
  0x70   : > { %v493_v43 = vmul.f32 %v1304_v12, %v435_v45  ;;  %v494_v47 = vmul.f32 %v1307_v13, %v437_v46  ;;  %v876_v37 = vpop.eup %875  ;;  %v460_v48 = vadd.f32 0.083333336, %v456_v54  ;;  %v482_v49 = vsub.f32 0.083333336, %v478_v55 }
  0x71   : > { %v495_v62 = vmul.f32 %v1310_v14, %v1368_v53  ;;  %v511_v25 = vmul.f32 0.5, %v1325_v32  ;;  %v878_v8 = vpop.eup %877  ;;  %v461_v39 = vadd.f32 0.083333336, %v457_v57  ;;  %v462_v36 = vadd.f32 0.083333336, %v458_v58 }
  0x72   : > { %v483_v27 = vsub.f32 0.083333336, %v479_v20  ;;  %v484_v51 = vmul.f32 %v480_v41, %v1301_v11  ;;  %v880_v26 = vpop.eup %879  ;;  %v463_v6 = vadd.f32 0.083333336, %v459_v56  ;;  %v496_v12 = vsub.f32 %v492_v3, %v1227_v16 }
  0x73   : > { %v497_v13 = vsub.f32 %v493_v43, %v1232_v18  ;;  %v512_v59 = vsub.f32 %v433_v44, %v508_v60  ;;  %v882_v54 = vpop.eup %881  ;;  %v485_v55 = vmul.f32 %v481_v40, %v1316_v17  ;;  %v498_v14 = vsub.f32 %v494_v47, %v1237_v19 }
  0x74   : > { %v513_v7 = vsub.f32 %v435_v45, %v509_v61  ;;  %v556_v57 = vmul.f32 %v1333_v35, %v1295_v9  ;;  %v464_v20 = vmul.f32 %v1283_v2, %v460_v48  ;;  %v486_v41 = vmul.f32 %v482_v49, %v1329_v33 }
  0x75   : > { %v884_v58 = vpop.eup %883  ;;  %v499_v11 = vsub.f32 %v495_v62, %v1243_v31  ;;  %v514_v16 = vsub.f32 %v437_v46, %v510_v34  ;;  %v465_v18 = vmul.f32 %v1297_v10, %v461_v39  ;;  %v466_v17 = vmul.f32 %v1312_v15, %v462_v36 }
  0x76   : > { %v1396_v56 = vpop.eup %885  ;;  %v487_v19 = vmul.f32 %v483_v27, %v1339_v38  ;;  %v515_v44 = vsub.f32 %v1368_v53, %v511_v25  ;;  %v467_v45 = vmul.f32 %v1325_v32, %v463_v6  ;;  %v500_v60 = vadd.f32 0.9189385, %v496_v12 }
  0x77   : > { %v501_v61 = vadd.f32 0.9189385, %v497_v13  ;;  %v516_v2 = vsub.f32 %v512_v59, %v484_v51  ;;  %v888_v40 = vpop.eup %887  ;;  %v502_v33 = vadd.f32 0.9189385, %v498_v14  ;;  %v517_v3 = vsub.f32 %v513_v7, %v485_v55 }
  0x78   : > { %v521_v31 = vmul.f32 0.6931472, %v872_v52  ;;  %v537_v46 = vmul.f32 %v880_v26, %v1276_v0  ;;  %v503_v34 = vadd.f32 0.9189385, %v499_v11  ;;  %v518_v43 = vsub.f32 %v514_v16, %v486_v41 }
  0x79   : > { %v523_v39 = vmul.f32 0.6931472, %v874_v28  ;;  %v539_v36 = vmul.f32 %v882_v54, %v1278_v1  ;;  %v1405_v27 = vsub.f32 %v515_v44, %v487_v19  ;;  %v541_v25 = vmul.f32 %v884_v58, %v1285_v4 }
  0x7a   : > { %v890_v10 = vpop.eup %889  ;;  %v544_v15 = vsel %vm344_vm0, %v537_v46, 0.0  ;;  %v561_v59 = vmul.f32 %v1396_v56, %v1396_v56  ;;  %v504_v7 = vadd.f32 %v500_v60, %v464_v20  ;;  %v505_v32 = vadd.f32 %v501_v61, %v465_v18  ;;  %v1517_v60 = vld [vmem:[#allocation10_spill] sm:$0xff]  ;;  %v1518_v61 = vld [vmem:[#allocation15_spill] sm:$0xff] }
  0x7b   : > { %v545_v26 = vsel %vm345_vm1, %v539_v36, 0.0  ;;  %v1414_v0 = vmul.f32 0.6931472, %v888_v40  ;;  %v506_v38 = vadd.f32 %v502_v33, %v466_v17  ;;  %v525_v1 = vmul.f32 0.6931472, %v876_v37  ;;  %v1520_v33 = vld [vmem:[#allocation18_spill] sm:$0xff] }
  0x7c   : > { %v528_v53 = vsel %vm344_vm0, %v521_v31, 0.0  ;;  %v564_v52 = vmul.f32 -0.0005952381, %v561_v59  ;;  %v529_v4 = vsel %vm345_vm1, %v523_v39, 0.0  ;;  %v548_v28 = vsub.f32 %v516_v2, %v544_v15  ;;  %v1522_v15 = vld [vmem:[#allocation13_spill] sm:$0xff] }
  0x7d   : > { %v549_v47 = vsub.f32 %v517_v3, %v545_v26  ;;  %v571_v48 = vmul.f32 0.003968254, %v561_v59  ;;  %v543_v49 = vmul.f32 %v890_v10, %v1287_v5  ;;  %v546_v62 = vsel %vm346_vm2, %v541_v25, 0.0  ;;  %v1521_v25 = vld [vmem:[#allocation12_spill] sm:$0xff] }
  0x7e   : > { %v565_v51 = vadd.f32 0.0007936508, %v564_v52  ;;  %891 = vlog2.f32 %v556_v57  ;;  %v527_v6 = vmul.f32 0.6931472, %v878_v8  ;;  %v577_v21 = vmul.f32 %v1362_v42, %v1414_v0 }
  0x7f   : > { %v572_v12 = vsub.f32 0.008333334, %v571_v48  ;;  %893 = vrcp.f32 %v556_v57  ;;  %v530_v22 = vsel %vm346_vm2, %v525_v1, 0.0  ;;  %v532_v37 = vsub.f32 %v504_v7, %v528_v53  ;;  %v1523_v1 = vld [vmem:[#allocation11_spill] sm:$0xff] }
  0x80   : > { %v533_v13 = vsub.f32 %v505_v32, %v529_v4  ;;  %v566_v54 = vmul.f32 %v565_v51, %v561_v59  ;;  %v550_v55 = vsub.f32 %v518_v43, %v546_v62  ;;  %v605_v5 = vmul.f32 %v1320_v29, %v548_v28 }
  0x81   : > { %v573_v14 = vmul.f32 %v572_v12, %v561_v59  ;;  %v606_v58 = vmul.f32 %v1323_v30, %v549_v47  ;;  %v507_v20 = vadd.f32 %v503_v34, %v467_v45  ;;  %v547_v8 = vsel %vm347_vm3, %v543_v49, 0.0 }
  0x82   : > { %v567_v41 = vadd.f32 -0.0027777778, %v566_v54  ;;  %v774_v42 = vadd.f32 -1.0, %v1160_v24  ;;  %v531_v23 = vsel %vm347_vm3, %v527_v6, 0.0  ;;  %v534_v57 = vsub.f32 %v506_v38, %v530_v22 }
  0x83   : > { %v578_v11 = vsub.f32 %v577_v21, %v1350_v50  ;;  %v581_v16 = vmul.f32 0.5, %v1396_v56  ;;  %v574_v17 = vsub.f32 0.083333336, %v573_v14  ;;  %v593_v29 = vsel %vm287_vm4, %v532_v37, 0.0  ;;  %v1519_v50 = vld [vmem:[#allocation17_spill] sm:$0xff]  ;;  %v1525_v21 = vld [vmem:[#allocation19_spill] sm:$0xff] }
  0x84   : > { %v568_v18 = vmul.f32 %v567_v41, %v561_v59  ;;  %v594_v30 = vsel %vm287_vm4, %v533_v13, 0.0  ;;  %v551_v19 = vsub.f32 %v1405_v27, %v547_v8  ;;  %v607_v44 = vmul.f32 %v1365_v63, %v550_v55  ;;  %v1526_v13 = vld [vmem:[#allocation14_spill] sm:$0xff] }
  0x85   : > { %v609_v45 = vsel %vm287_vm4, %v605_v5, 0.0  ;;  %v610_v24 = vsel %vm287_vm4, %v606_v58, 0.0  ;;  %v315_v2 = vmul.f32 %v1518_v61, %v1517_v60  ;;  %v317_v40 = vsel %vm287_vm4, %v1519_v50, 0.0 }
  0x86   : > { %v318_v3 = vsel %vm287_vm4, %v1520_v33, 0.0  ;;  %v569_v31 = vadd.f32 0.083333336, %v568_v18  ;;  %v535_v46 = vsub.f32 %v507_v20, %v531_v23  ;;  %v579_v34 = vadd.f32 0.9189385, %v578_v11 }
  0x87   : > { %v582_v43 = vsub.f32 %v1414_v0, %v581_v16  ;;  %v595_v39 = vadd.f32 %v594_v30, %v593_v29  ;;  %v575_v36 = vmul.f32 %v574_v17, %v561_v59  ;;  %v596_v10 = vsel %vm287_vm4, %v534_v57, 0.0 }
  0x88   : > { %v570_v63 = vmul.f32 %v1396_v56, %v569_v31  ;;  %v611_v27 = vadd.f32 %v610_v24, %v609_v45  ;;  %v307_v7 = vadd.f32 %v1522_v15, %v1521_v25  ;;  %v555_v32 = vadd.f32 %v1333_v35, %v1295_v9  ;;  %v1524_v56 = vld [vmem:[#allocation16_spill] sm:$0xff] }
  0x89   : > { %v608_v26 = vmul.f32 %v774_v42, %v551_v19  ;;  %v612_v38 = vsel %vm287_vm4, %v607_v44, 0.0  ;;  %v308_v53 = vsel %vm287_vm4, %v1523_v1, 0.0  ;;  %v319_v0 = vadd.f32 %v318_v3, %v317_v40  ;;  %v623_v44 = vld [vmem:[#allocation2] sm:$0x3] }
  0x8a   : > { %v316_v59 = vmul.f32 %v1524_v56, %v1523_v1  ;;  %v320_v4 = vsel %vm287_vm4, %v315_v2, 0.0  ;;  %v580_v28 = vadd.f32 %v579_v34, %v570_v63  ;;  %v597_v47 = vadd.f32 %v596_v10, %v595_v39 }
  0x8b   : > { %v892_v52 = vpop.eup %891  ;;  %v583_v49 = vsub.f32 %v582_v43, %v575_v36  ;;  %v598_v9 = vsel %vm287_vm4, %v535_v46, 0.0  ;;  %v613_v35 = vadd.f32 %v612_v38, %v611_v27  ;;  %v309_v51 = vadd.f32 %v308_v53, %v307_v7 }
  0x8c   : > { %v894_v48 = vpop.eup %893  ;;  %v585_v62 = vmul.f32 0.6931472, %v892_v52  ;;  %v614_v12 = vsel %vm287_vm4, %v608_v26, 0.0  ;;  %v311_v22 = vmul.f32 0.6931472, %v1525_v21  ;;  %v321_v37 = vadd.f32 %v320_v4, %v319_v0 }
  0x8d   : > { %v589_v6 = vmul.f32 %v894_v48, %v555_v32  ;;  %v775_v55 = vadd.f32 -4.0, %v1526_v13  ;;  %v322_v14 = vsel %vm287_vm4, %v316_v59, 0.0  ;;  %v599_v20 = vadd.f32 %v598_v9, %v597_v47 }
  0x8e   : > { %v586_v54 = vsel %vm552_vm5, %v585_v62, 0.0  ;;  %v615_v41 = vadd.f32 %v614_v12, %v613_v35  ;;  %v312_v23 = vmul.f32 %v311_v22, %v309_v51  ;;  %v323_v57 = vadd.f32 %v322_v14, %v321_v37 }
  0x8f   : > { %v587_v5 = vsub.f32 %v580_v28, %v586_v54  ;;  %v590_v58 = vsel %vm552_vm5, %v589_v6, 0.0  ;;  %v620_v17 = vstv %s282_s24  ;;  %vm641_vm6 = vcmask 0  }
  0x90   : > { %v591_v8 = vsub.f32 %v583_v49, %v590_v58  ;;  %v324_v29 = vsub.f32 %v312_v23, %v323_v57 }
  0x91   : > { %v770_v42 = vadd.f32 -1.7917595, %v587_v5 }
  0x92   : > { %v617_v11 = vmul.f32 %v775_v55, %v591_v8 }
  0x93   : > { %v600_v16 = vsub.f32 %v770_v42, %v599_v20 }
  0x94   : > { %v618_v18 = vsub.f32 %v615_v41, %v617_v11 }
  0x96   : > { %v619_v30 = vadd.f32 %v618_v18, %v600_v16 }
  0x98   : > { %v621_v19 = vmul.f32 %v620_v17, %v619_v30 }
  0x9a   : > { %v622_v45 = vadd.f32 %v621_v19, %v324_v29 }
  0x9c   : > { %v624_v24 = vadd.f32 %v623_v44, %v622_v45 }
  0x9e   : > { %625 = vst [vmem:[#allocation2] sm:$0x3] %v624_v24 }
  0xa5   : > { %v629_v60 = vld [vmem:[#allocation2] sm:$0x3] }
  0xa6   : > { %v630_v61 = vsel %vm287_vm4, %v629_v60, 0.0 }
  0xa7   : > { %631 = vadd.xlane.f32.xlu0 %v630_v61 }
 0x130   : > { %v632_v2 = vpop.xlane.xlu0 %631 }
 0x131   : > { %v633_v50 = vrot.slane %v632_v2, 4 }
 0x133   : > { %v634_v40 = vadd.f32 %v633_v50, %v632_v2 }
 0x135   : > { %v635_v33 = vrot.slane %v634_v40, 2 }
 0x137   : > { %v636_v3 = vadd.f32 %v635_v33, %v634_v40 }
 0x139   : > { %v637_v31 = vrot.slane %v636_v3, 1 }
 0x13b   : > { %v638_v46 = vadd.f32 %v637_v31, %v636_v3 }
 0x13d   : > { %780 = vpush %v638_v46 }
 0x16e   : > { %s781_s0 = spop %780 }
 0x16f   : > { %v640_v34 = vstv %s781_s0 }
 0x170   : > { %642 = vst.msk [vmem:[%s268_s14] sm:$0x1] %vm641_vm6, %v640_v34 }
 0x171 PF: > { %s20_s19 = sadd.s32 1, %s1005_s19   ;;  %s1527_s14 = smov %s989_s15 }
 0x172   : > { %p17_p9 = scmp.ge.s32.totalorder %s20_s19, 4   ;;  %s1528_s15 = smov %s993_s16 }
 0x173   : > { %s1529_s16 = smov %s1084_s25  ;;  %s1530_s17 = smov %s1001_s18 }
 0x174   : > { %s1531_s18 = smov %s1533_s20  ;;  %19 = sbr.rel (!%p17_p9) target bundleno = 8 (0x8), region = 93 }
 0x179   :  { %666 = vsyncpa [#allocation5], 1 }
 0x17a   :  { %668 = vsyncpa [#allocation5 + $0x1], 1 }
 0x17b   :  { %669 = vsyncpa [#allocation7], 1 }
 0x17c   :  { %671 = vsyncpa [#allocation7 + $0x1], 1 }

</bundles_post_ra>
